<compile_context>
chip_gen: v6e
topology: v6e:2x2x1
jax: 0.10.0
libtpu: 0.0.40
codegen_flags: <defaults>
</compile_context>

<pallas_src>
import functools

import jax
import jax.numpy as jnp
from jax.experimental import pallas as pl
from jax.experimental.pallas import tpu as pltpu


# bf16 matmul inputs (f32 accumulate) per the v6e/v7x recommendation.
# Set to jnp.float32 for bit-parity with the PyTorch module (or on v5e).
MATMUL_DTYPE = jnp.bfloat16


def _round_up(x, m):
    return ((x + m - 1) // m) * m


# ----------------------------------------------------------------------------
# Pallas kernel 1: per-batch exact pairwise squared distances (square_distance)
# computed on the VPU (no MXU).  src [S, 3], dst_t [3, N]  ->  dist [S, N].
# ----------------------------------------------------------------------------
def _sqdist_kernel(src_ref, dstT_ref, out_ref):
    src = src_ref[0]        # [S, 3]  (tiny; coords on lanes, masked load is cheap)
    dst = dstT_ref[0]       # [3, N]  (lane-dense rows)
    acc = None
    for c in range(3):      # unrolled: 3 VPU multiply-adds over the [S, N] tile
        d = src[:, c:c + 1] - dst[c:c + 1, :]        # [S,1] - [1,N] -> [S,N]
        sq = d * d
        acc = sq if acc is None else acc + sq
    out_ref[0] = acc


def square_distance(src, dst_t):
    # src [B, S, 3], dst_t [B, 3, N] -> exact squared distances [B, S, N]
    B, S, _ = src.shape
    N = dst_t.shape[-1]
    return pl.pallas_call(
        _sqdist_kernel,
        out_shape=jax.ShapeDtypeStruct((B, S, N), jnp.float32),
        grid=(B,),
        in_specs=[pl.BlockSpec((1, S, 3), lambda b: (b, 0, 0)),
                  pl.BlockSpec((1, 3, N), lambda b: (b, 0, 0))],
        out_specs=pl.BlockSpec((1, S, N), lambda b: (b, 0, 0)),
        compiler_params=pltpu.CompilerParams(dimension_semantics=("parallel",)),
    )(src, dst_t)


# ----------------------------------------------------------------------------
# Pallas kernel 2: shared MLP (1x1 conv) + folded BN(eval) + ReLU (x2) + max over
# the nsample (neighbor) axis.  Batch is folded into M; the grid tiles M only.
#   x_flat [rows, Cin_p] (rows = B*S*K, (b,s,k) order)  ->  out [B*S, C2_p]
# ----------------------------------------------------------------------------
def _mlp_max_kernel(x_ref, w1_ref, s1_ref, t1_ref, w2_ref, s2_ref, t2_ref, o_ref, *, K):
    x = x_ref[...]                                                     # [TS*K, Cin_p] bf16
    h = jnp.dot(x, w1_ref[...], preferred_element_type=jnp.float32)    # MXU -> f32
    h = jnp.maximum(h * s1_ref[...] + t1_ref[...], 0.0)                # BN(eval) + ReLU
    h = jnp.dot(h.astype(MATMUL_DTYPE), w2_ref[...],
                preferred_element_type=jnp.float32)                    # [TS*K, C2_p]
    h = jnp.maximum(h * s2_ref[...] + t2_ref[...], 0.0)
    rows, c2p = h.shape
    # Layout-preserving regroup (lane dim kept at 128) + max over neighbors.
    o_ref[...] = jnp.max(h.reshape(rows // K, K, c2p), axis=1)


def mlp_max(x_flat, w1p, s1, t1, w2p, s2, t2, *, K, BS):
    rows, Cin_p = x_flat.shape
    C1p = w1p.shape[1]
    C2p = w2p.shape[1]

    # Tile over (b, s) groups; keep every tile's working set small so it also
    # fits the v7x 64 MiB VMEM comfortably at production sizes.
    TS = BS if BS <= 256 else 256
    BS_p = pl.cdiv(BS, TS) * TS
    if BS_p != BS:
        x_flat = jnp.pad(x_flat, ((0, (BS_p - BS) * K), (0, 0)))
    n_tiles = BS_p // TS

    out = pl.pallas_call(
        functools.partial(_mlp_max_kernel, K=K),
        out_shape=jax.ShapeDtypeStruct((BS_p, C2p), jnp.float32),
        grid=(n_tiles,),
        in_specs=[
            pl.BlockSpec((TS * K, Cin_p), lambda i: (i, 0)),   # activations: tiled over M
            pl.BlockSpec((Cin_p, C1p), lambda i: (0, 0)),      # weights resident
            pl.BlockSpec((1, C1p), lambda i: (0, 0)),
            pl.BlockSpec((1, C1p), lambda i: (0, 0)),
            pl.BlockSpec((C1p, C2p), lambda i: (0, 0)),
            pl.BlockSpec((1, C2p), lambda i: (0, 0)),
            pl.BlockSpec((1, C2p), lambda i: (0, 0)),
        ],
        out_specs=pl.BlockSpec((TS, C2p), lambda i: (i, 0)),   # lane-dense (C2p = 128k)
        compiler_params=pltpu.CompilerParams(dimension_semantics=("parallel",)),
    )(x_flat, w1p, s1, t1, w2p, s2, t2)
    return out[:BS]


# ----------------------------------------------------------------------------
# JAX glue: FPS (sequential, data dependent), gathers, kNN selection.
# ----------------------------------------------------------------------------
def index_points(points, idx):
    # points [B, N, C], idx [B, ...] -> [B, ..., C]
    return jax.vmap(lambda p, i: p[i])(points, idx)


def farthest_point_sample(xyz, npoint):
    # TODO(synk): for production N, move this loop into a Pallas kernel that keeps xyz
    #             resident in VMEM instead of npoint HBM round-trips.
    B, N, _ = xyz.shape
    iota = jnp.arange(N, dtype=jnp.int32)[None, :]                      # [1, N]

    def body(i, state):
        centroids, distance, farthest = state
        centroids = centroids.at[:, i].set(farthest)
        # one-hot contraction instead of a per-iteration dynamic gather
        onehot = (iota == farthest[:, None]).astype(xyz.dtype)          # [B, N]
        centroid = jnp.einsum("bn,bnc->bc", onehot, xyz)[:, None, :]    # [B, 1, 3]
        dist = jnp.sum((xyz - centroid) ** 2, axis=-1)                  # [B, N]
        distance = jnp.minimum(distance, dist)
        farthest = jnp.argmax(distance, axis=-1).astype(jnp.int32)
        return centroids, distance, farthest

    centroids0 = jnp.zeros((B, npoint), dtype=jnp.int32)
    distance0 = jnp.full((B, N), 1e10, dtype=jnp.float32)
    farthest0 = jnp.zeros((B,), dtype=jnp.int32)
    centroids, _, _ = jax.lax.fori_loop(0, npoint, body,
                                        (centroids0, distance0, farthest0))
    return centroids


def _fold_bn_pad(w, b, gamma, beta, rmean, rvar, cin_pad, cout_pad, eps=1e-5):
    # conv(1x1) + BN(eval)  ->  x @ w.T * scale + shift, zero-padded to aligned shapes
    scale = gamma / jnp.sqrt(rvar + eps)
    shift = (b - rmean) * scale + beta
    cout, cin = w.shape
    wt = jnp.zeros((cin_pad, cout_pad), jnp.float32).at[:cin, :cout].set(w.T)
    s = jnp.zeros((1, cout_pad), jnp.float32).at[:, :cout].set(scale[None, :])
    t = jnp.zeros((1, cout_pad), jnp.float32).at[:, :cout].set(shift[None, :])
    return wt.astype(MATMUL_DTYPE), s, t


def transition_down(xyz, points, params, *, npoint, nsample):
    # == PointNetSetAbstraction(k, 0, nneighbor, C_in, [C1, C2], group_all=False, knn=True)
    B, N, _ = xyz.shape
    D = points.shape[-1]
    C1 = params["w1"].shape[0]
    C2 = params["w2"].shape[0]
    Cin = D + 3
    Cin_p = _round_up(Cin, 8)
    C1p = _round_up(C1, 128)
    C2p = _round_up(C2, 128)

    # ---- sampling + kNN grouping ----
    fps_idx = farthest_point_sample(xyz, npoint)                        # [B, S]
    new_xyz = index_points(xyz, fps_idx)                                # [B, S, 3]
    dists = square_distance(new_xyz, jnp.transpose(xyz, (0, 2, 1)))     # Pallas (VPU)
    _, idx = jax.lax.top_k(-dists, nsample)                             # k smallest, no sort
    grouped_xyz = index_points(xyz, idx)                                # [B, S, K, 3]
    grouped_xyz_norm = grouped_xyz - new_xyz[:, :, None, :]
    grouped_points = index_points(points, idx)                          # [B, S, K, D]
    new_points = jnp.concatenate([grouped_xyz_norm, grouped_points], axis=-1)

    # ---- shared MLP + BN(eval) + ReLU + max over neighbors (Pallas, MXU) ----
    w1p, s1, t1 = _fold_bn_pad(params["w1"], params["b1"], params["g1"], params["be1"],
                               params["rm1"], params["rv1"], Cin_p, C1p)
    w2p, s2, t2 = _fold_bn_pad(params["w2"], params["b2"], params["g2"], params["be2"],
                               params["rm2"], params["rv2"], C1p, C2p)

    x_flat = new_points.reshape(B * npoint * nsample, Cin)
    x_flat = jnp.pad(x_flat, ((0, 0), (0, Cin_p - Cin))).astype(MATMUL_DTYPE)
    feats = mlp_max(x_flat, w1p, s1, t1, w2p, s2, t2, K=nsample, BS=B * npoint)
    feats = feats[:, :C2].reshape(B, npoint, C2)
    return new_xyz, feats


def init_params(key, channels):
    c_in, c1, c2 = channels
    ks = jax.random.split(key, 8)

    def nrm(k, shape, s=0.1):
        return s * jax.random.normal(k, shape, jnp.float32)

    return dict(
        w1=nrm(ks[0], (c1, c_in)), b1=nrm(ks[1], (c1,)),
        g1=1.0 + nrm(ks[2], (c1,)), be1=nrm(ks[3], (c1,)),
        rm1=jnp.zeros((c1,), jnp.float32), rv1=jnp.ones((c1,), jnp.float32),
        w2=nrm(ks[4], (c2, c1)), b2=nrm(ks[5], (c2,)),
        g2=1.0 + nrm(ks[6], (c2,)), be2=nrm(ks[7], (c2,)),
        rm2=jnp.zeros((c2,), jnp.float32), rv2=jnp.ones((c2,), jnp.float32),
    )


if __name__ == "__main__":
    key = jax.random.PRNGKey(0)
    kx, kp, kw = jax.random.split(key, 3)

    B, N, D = 2, 64, 4            # batch, input points, point-feature dim
    npoint, nsample = 16, 8       # TransitionDown(k=16, nneighbor=8, ...)
    channels = [D + 3, 32, 32]    # channels[0] = D + 3 (grouped xyz offsets concatenated)

    xyz = jax.random.normal(kx, (B, N, 3), jnp.float32)
    points = jax.random.normal(kp, (B, N, D), jnp.float32)
    params = init_params(kw, channels)

    fwd = jax.jit(functools.partial(transition_down, npoint=npoint, nsample=nsample))
    new_xyz, new_feats = fwd(xyz, points, params)
    jax.block_until_ready((new_xyz, new_feats))

    assert new_xyz.shape == (B, npoint, 3)
    assert new_feats.shape == (B, npoint, channels[-1])
    assert bool(jnp.all(jnp.isfinite(new_feats)))
    print("KERNEL_OK")
</pallas_src>

<mosaic_0001>
module attributes {stable_mosaic.version = 11 : i64} {
  func.func @_sqdist_kernel(%arg0: i32, %arg1: memref<1x16x3xf32, #tpu.memory_space<vmem>>, %arg2: memref<1x3x64xf32, #tpu.memory_space<vmem>>, %arg3: memref<1x16x64xf32, #tpu.memory_space<vmem>>) attributes {dimension_semantics = [#tpu.dimension_semantics<parallel>], iteration_bounds = array<i64: 2>, scalar_prefetch = 0 : i64, scratch_operands = 0 : i64, tpu.core_type = #tpu.core_type<tc>, window_params = [{transform_indices = @transform_0, window_bounds = array<i64: 1, 16, 3>}, {transform_indices = @transform_1, window_bounds = array<i64: 1, 3, 64>}, {transform_indices = @transform_2, window_bounds = array<i64: 1, 16, 64>}]} {
    %c0 = arith.constant 0 : index
    %c0_0 = arith.constant 0 : index
    %c0_1 = arith.constant 0 : index
    %0 = vector.load %arg1[%c0, %c0_0, %c0_1] : memref<1x16x3xf32, #tpu.memory_space<vmem>>, vector<1x16x3xf32>
    %1 = vector.shape_cast %0 : vector<1x16x3xf32> to vector<16x3xf32>
    %c0_2 = arith.constant 0 : index
    %c0_3 = arith.constant 0 : index
    %c0_4 = arith.constant 0 : index
    %2 = vector.load %arg2[%c0_2, %c0_3, %c0_4] : memref<1x3x64xf32, #tpu.memory_space<vmem>>, vector<1x3x64xf32>
    %3 = vector.shape_cast %2 : vector<1x3x64xf32> to vector<3x64xf32>
    %4 = vector.extract_strided_slice %1 {offsets = [0, 0], sizes = [16, 1], strides = [1, 1]} : vector<16x3xf32> to vector<16x1xf32>
    %5 = vector.extract_strided_slice %3 {offsets = [0, 0], sizes = [1, 64], strides = [1, 1]} : vector<3x64xf32> to vector<1x64xf32>
    %6 = vector.broadcast %4 : vector<16x1xf32> to vector<16x64xf32>
    %7 = vector.broadcast %5 : vector<1x64xf32> to vector<16x64xf32>
    %8 = arith.subf %6, %7 : vector<16x64xf32>
    %9 = arith.mulf %8, %8 : vector<16x64xf32>
    %10 = vector.extract_strided_slice %1 {offsets = [0, 1], sizes = [16, 1], strides = [1, 1]} : vector<16x3xf32> to vector<16x1xf32>
    %11 = vector.extract_strided_slice %3 {offsets = [1, 0], sizes = [1, 64], strides = [1, 1]} : vector<3x64xf32> to vector<1x64xf32>
    %12 = vector.broadcast %10 : vector<16x1xf32> to vector<16x64xf32>
    %13 = vector.broadcast %11 : vector<1x64xf32> to vector<16x64xf32>
    %14 = arith.subf %12, %13 : vector<16x64xf32>
    %15 = arith.mulf %14, %14 : vector<16x64xf32>
    %16 = arith.addf %9, %15 : vector<16x64xf32>
    %17 = vector.extract_strided_slice %1 {offsets = [0, 2], sizes = [16, 1], strides = [1, 1]} : vector<16x3xf32> to vector<16x1xf32>
    %18 = vector.extract_strided_slice %3 {offsets = [2, 0], sizes = [1, 64], strides = [1, 1]} : vector<3x64xf32> to vector<1x64xf32>
    %19 = vector.broadcast %17 : vector<16x1xf32> to vector<16x64xf32>
    %20 = vector.broadcast %18 : vector<1x64xf32> to vector<16x64xf32>
    %21 = arith.subf %19, %20 : vector<16x64xf32>
    %22 = arith.mulf %21, %21 : vector<16x64xf32>
    %23 = arith.addf %16, %22 : vector<16x64xf32>
    %c0_5 = arith.constant 0 : index
    %c0_6 = arith.constant 0 : index
    %c0_7 = arith.constant 0 : index
    %24 = vector.load %arg3[%c0_5, %c0_6, %c0_7] : memref<1x16x64xf32, #tpu.memory_space<vmem>>, vector<1x16x64xf32>
    %25 = vector.shape_cast %24 : vector<1x16x64xf32> to vector<16x64xf32>
    %26 = vector.shape_cast %23 : vector<16x64xf32> to vector<1x16x64xf32>
    tpu.vector_store %arg3[%c0_5, %c0_6, %c0_7], %26 {strides = array<i32>} : memref<1x16x64xf32, #tpu.memory_space<vmem>>, vector<1x16x64xf32>,
    return
  }
  func.func @transform_0(%arg0: i32) -> (i32, i32, i32) {
    %c0_i32 = arith.constant 0 : i32
    %c0_i32_0 = arith.constant 0 : i32
    %c0_i32_1 = arith.constant 0 : i32
    return %arg0, %c0_i32, %c0_i32_0 : i32, i32, i32
  }
  func.func @transform_1(%arg0: i32) -> (i32, i32, i32) {
    %c0_i32 = arith.constant 0 : i32
    %c0_i32_0 = arith.constant 0 : i32
    %c0_i32_1 = arith.constant 0 : i32
    return %arg0, %c0_i32, %c0_i32_0 : i32, i32, i32
  }
  func.func @transform_2(%arg0: i32) -> (i32, i32, i32) {
    %c0_i32 = arith.constant 0 : i32
    %c0_i32_0 = arith.constant 0 : i32
    %c0_i32_1 = arith.constant 0 : i32
    return %arg0, %c0_i32, %c0_i32_0 : i32, i32, i32
  }
}

module attributes {stable_mosaic.version = 11 : i64} {
  func.func @_mlp_max_kernel(%arg0: i32, %arg1: memref<256x8xbf16, #tpu.memory_space<vmem>>, %arg2: memref<8x128xbf16, #tpu.memory_space<vmem>>, %arg3: memref<1x128xf32, #tpu.memory_space<vmem>>, %arg4: memref<1x128xf32, #tpu.memory_space<vmem>>, %arg5: memref<128x128xbf16, #tpu.memory_space<vmem>>, %arg6: memref<1x128xf32, #tpu.memory_space<vmem>>, %arg7: memref<1x128xf32, #tpu.memory_space<vmem>>, %arg8: memref<32x128xf32, #tpu.memory_space<vmem>>) attributes {dimension_semantics = [#tpu.dimension_semantics<parallel>], iteration_bounds = array<i64: 1>, scalar_prefetch = 0 : i64, scratch_operands = 0 : i64, tpu.core_type = #tpu.core_type<tc>, window_params = [{transform_indices = @transform_0, window_bounds = array<i64: 256, 8>}, {pipeline_mode = #tpu.pipeline_mode<synchronous>, transform_indices = @transform_1, window_bounds = array<i64: 8, 128>}, {pipeline_mode = #tpu.pipeline_mode<synchronous>, transform_indices = @transform_2, window_bounds = array<i64: 1, 128>}, {pipeline_mode = #tpu.pipeline_mode<synchronous>, transform_indices = @transform_3, window_bounds = array<i64: 1, 128>}, {pipeline_mode = #tpu.pipeline_mode<synchronous>, transform_indices = @transform_4, window_bounds = array<i64: 128, 128>}, {pipeline_mode = #tpu.pipeline_mode<synchronous>, transform_indices = @transform_5, window_bounds = array<i64: 1, 128>}, {pipeline_mode = #tpu.pipeline_mode<synchronous>, transform_indices = @transform_6, window_bounds = array<i64: 1, 128>}, {transform_indices = @transform_7, window_bounds = array<i64: 32, 128>}]} {
    %c0 = arith.constant 0 : index
    %c0_0 = arith.constant 0 : index
    %0 = vector.load %arg1[%c0, %c0_0] : memref<256x8xbf16, #tpu.memory_space<vmem>>, vector<256x8xbf16>
    %c0_1 = arith.constant 0 : index
    %c0_2 = arith.constant 0 : index
    %1 = vector.load %arg2[%c0_1, %c0_2] : memref<8x128xbf16, #tpu.memory_space<vmem>>, vector<8x128xbf16>
    %cst = arith.constant dense<0.000000e+00> : vector<256x128xf32>
    %2 = tpu.matmul %0, %1, %cst {dimension_numbers = #tpu.dot_dimension_numbers<[1], [0], [0], [1], [0, 0, 1, 1], [], []>} : vector<256x8xbf16>, vector<8x128xbf16>, vector<256x128xf32> -> vector<256x128xf32>
    %c0_3 = arith.constant 0 : index
    %c0_4 = arith.constant 0 : index
    %3 = vector.load %arg3[%c0_3, %c0_4] : memref<1x128xf32, #tpu.memory_space<vmem>>, vector<1x128xf32>
    %4 = vector.broadcast %3 : vector<1x128xf32> to vector<256x128xf32>
    %5 = arith.mulf %2, %4 : vector<256x128xf32>
    %c0_5 = arith.constant 0 : index
    %c0_6 = arith.constant 0 : index
    %6 = vector.load %arg4[%c0_5, %c0_6] : memref<1x128xf32, #tpu.memory_space<vmem>>, vector<1x128xf32>
    %7 = vector.broadcast %6 : vector<1x128xf32> to vector<256x128xf32>
    %8 = arith.addf %5, %7 : vector<256x128xf32>
    %cst_7 = arith.constant 0.000000e+00 : f32
    %9 = vector.broadcast %cst_7 : f32 to vector<256x128xf32>
    %10 = arith.maximumf %8, %9 : vector<256x128xf32>
    %11 = arith.truncf %10 : vector<256x128xf32> to vector<256x128xbf16>
    %c0_8 = arith.constant 0 : index
    %c0_9 = arith.constant 0 : index
    %12 = vector.load %arg5[%c0_8, %c0_9] : memref<128x128xbf16, #tpu.memory_space<vmem>>, vector<128x128xbf16>
    %cst_10 = arith.constant dense<0.000000e+00> : vector<256x128xf32>
    %13 = tpu.matmul %11, %12, %cst_10 {dimension_numbers = #tpu.dot_dimension_numbers<[1], [0], [0], [1], [0, 0, 1, 1], [], []>} : vector<256x128xbf16>, vector<128x128xbf16>, vector<256x128xf32> -> vector<256x128xf32>
    %c0_11 = arith.constant 0 : index
    %c0_12 = arith.constant 0 : index
    %14 = vector.load %arg6[%c0_11, %c0_12] : memref<1x128xf32, #tpu.memory_space<vmem>>, vector<1x128xf32>
    %15 = vector.broadcast %14 : vector<1x128xf32> to vector<256x128xf32>
    %16 = arith.mulf %13, %15 : vector<256x128xf32>
    %c0_13 = arith.constant 0 : index
    %c0_14 = arith.constant 0 : index
    %17 = vector.load %arg7[%c0_13, %c0_14] : memref<1x128xf32, #tpu.memory_space<vmem>>, vector<1x128xf32>
    %18 = vector.broadcast %17 : vector<1x128xf32> to vector<256x128xf32>
    %19 = arith.addf %16, %18 : vector<256x128xf32>
    %cst_15 = arith.constant 0.000000e+00 : f32
    %20 = vector.broadcast %cst_15 : f32 to vector<256x128xf32>
    %21 = arith.maximumf %19, %20 : vector<256x128xf32>
    %22 = vector.shape_cast %21 : vector<256x128xf32> to vector<32x8x128xf32>
    %cst_16 = arith.constant dense<0xFF800000> : vector<32x128xf32>
    %23 = vector.multi_reduction <maximumf>, %22, %cst_16 [1] : vector<32x8x128xf32> to vector<32x128xf32>
    %c0_17 = arith.constant 0 : index
    %c0_18 = arith.constant 0 : index
    %24 = vector.load %arg8[%c0_17, %c0_18] : memref<32x128xf32, #tpu.memory_space<vmem>>, vector<32x128xf32>
    tpu.vector_store %arg8[%c0_17, %c0_18], %23 {strides = array<i32>} : memref<32x128xf32, #tpu.memory_space<vmem>>, vector<32x128xf32>,
    return
  }
  func.func @transform_0(%arg0: i32) -> (i32, i32) {
    %c0_i32 = arith.constant 0 : i32
    %c0_i32_0 = arith.constant 0 : i32
    return %arg0, %c0_i32 : i32, i32
  }
  func.func @transform_1(%arg0: i32) -> (i32, i32) {
    %c0_i32 = arith.constant 0 : i32
    %c0_i32_0 = arith.constant 0 : i32
    %c0_i32_1 = arith.constant 0 : i32
    return %c0_i32, %c0_i32_0 : i32, i32
  }
  func.func @transform_2(%arg0: i32) -> (i32, i32) {
    %c0_i32 = arith.constant 0 : i32
    %c0_i32_0 = arith.constant 0 : i32
    %c0_i32_1 = arith.constant 0 : i32
    return %c0_i32, %c0_i32_0 : i32, i32
  }
  func.func @transform_3(%arg0: i32) -> (i32, i32) {
    %c0_i32 = arith.constant 0 : i32
    %c0_i32_0 = arith.constant 0 : i32
    %c0_i32_1 = arith.constant 0 : i32
    return %c0_i32, %c0_i32_0 : i32, i32
  }
  func.func @transform_4(%arg0: i32) -> (i32, i32) {
    %c0_i32 = arith.constant 0 : i32
    %c0_i32_0 = arith.constant 0 : i32
    %c0_i32_1 = arith.constant 0 : i32
    return %c0_i32, %c0_i32_0 : i32, i32
  }
  func.func @transform_5(%arg0: i32) -> (i32, i32) {
    %c0_i32 = arith.constant 0 : i32
    %c0_i32_0 = arith.constant 0 : i32
    %c0_i32_1 = arith.constant 0 : i32
    return %c0_i32, %c0_i32_0 : i32, i32
  }
  func.func @transform_6(%arg0: i32) -> (i32, i32) {
    %c0_i32 = arith.constant 0 : i32
    %c0_i32_0 = arith.constant 0 : i32
    %c0_i32_1 = arith.constant 0 : i32
    return %c0_i32, %c0_i32_0 : i32, i32
  }
  func.func @transform_7(%arg0: i32) -> (i32, i32) {
    %c0_i32 = arith.constant 0 : i32
    %c0_i32_0 = arith.constant 0 : i32
    return %arg0, %c0_i32 : i32, i32
  }
}

</mosaic_0001>

<bundles_post_ra>
// kernel: custom-call.6
= control target key start
LH: loop header
LB: loop body
LE: loop exit
PB: predicated region body
PF: predicated region fallthrough
CT: control target
= control target key end

     0   :  { %s6_s0 = inlined_call_operand.vmem [shape: f32[2,64], index: 0, kind: output, shape index: {}]  }

// kernel: neg.1
= control target key start
LH: loop header
LB: loop body
LE: loop exit
PB: predicated region body
PF: predicated region fallthrough
CT: control target
= control target key end

     0   :  { %s72_s0 = inlined_call_operand.vmem [shape: f32[2,16,64], index: 0, kind: input, shape index: {}]   ;;  %s73_s1 = inlined_call_operand.vmem [shape: f32[2,16,64], index: 1, kind: output, shape index: {}]  }
   0x1   :  { %v2_v0 = vld [vmem:[%s72_s0] sm:$0xff]  ;;  %v32_v1 = vld [vmem:[%s72_s0 + $0x10] sm:$0xff]  ;;  %v34_v2 = vld [vmem:[%s72_s0 + $0x8] sm:$0xff] }
   0x2   :  { %v5_v3 = vxor.u32 2147483648, %v2_v0  ;;  %v12_v4 = vxor.u32 2147483648, %v32_v1  ;;  %v20_v5 = vxor.u32 2147483648, %v34_v2  ;;  %v36_v6 = vld [vmem:[%s72_s0 + $0x18] sm:$0xff] }
   0x3   :  { %v28_v7 = vxor.u32 2147483648, %v36_v6 }
   0x4   :  { %7 = vst [vmem:[%s73_s1] sm:$0xff] %v5_v3  ;;  %33 = vst [vmem:[%s73_s1 + $0x10] sm:$0xff] %v12_v4 }
   0x5   :  { %35 = vst [vmem:[%s73_s1 + $0x8] sm:$0xff] %v20_v5  ;;  %37 = vst [vmem:[%s73_s1 + $0x18] sm:$0xff] %v28_v7 }

// kernel: transition_down.2
= control target key start
LH: loop header
LB: loop body
LE: loop exit
PB: predicated region body
PF: predicated region fallthrough
CT: control target
= control target key end

     0   :  { %s343_s9 = smov 0   ;;  %s371_s0 = inlined_call_operand.vmem [shape: f32[2,16,3], index: 0, kind: input, shape index: {}]   ;;  %s372_s1 = inlined_call_operand.vmem [shape: f32[2,3,64], index: 1, kind: input, shape index: {}]   ;;  %s373_s2 = inlined_call_operand.vmem [shape: f32[2,16,64], index: 2, kind: output, shape index: {}]  }
   0x1 LB: > { %s288_s10 = sadd.s32 4294967295, %s323_s9   ;;  %p292_p0 = scmp.ge.s32.totalorder %s323_s9, 1  ;;  %s323_s9 = sphi %s343_s9, %s12_s9  }
   0x2   : > { %p121_p1 = scmp.lt.s32.totalorder %s323_s9, 3 }
   0x4   : > { %p122_p2 = pnand %p292_p0, %p121_p1 }
   0x5   : > { %p147_p3 = scmp.lt.s32.totalorder (!%p122_p2), %s288_s10, 1 }
   0x6   : > { %125 = sbr.rel (%p122_p2) target bundleno = 155 (0x9b), region = 28 }
   0xb   : > { %v325_v0 = vmov 1   ;;  %v326_v1 = vmov 0   ;;  %s375_s10 = smov (!%p147_p3, %s288_s10), 1  ;;  %v327_v4 = vmov 2   ;;  %v174_v5 = vlaneseq }
   0xc   : > { %314 = vset.pattern.permute.xlu1 %v325_v0  ;;  %313 = vset.pattern.permute.xlu0 %v326_v1  ;;  %s300_s11 = sshll.u32 %s375_s10, 4  ;;  %s295_s15 = sshll.u32 %s375_s10, 2  ;;  %vm218_vm0 = vcmask 523264  }
   0xd   : > { %s151_s14 = scalar_lea.vmem %s371_s0, %s300_s11  ;;  %v175_v6 = vshrl.u32 %v174_v5, 7  ;;  %s155_s18 = scalar_lea.vmem %s372_s1, %s295_s15 }
   0xe   : > { %v161_v2 = vld [vmem:[%s151_s14] sm:$0xff]  ;;  %v162_v3 = vld [vmem:[%s151_s14 + $0x8] sm:$0xff]  ;;  %s160_s21 = scalar_lea.vmem %s373_s2, %s300_s11 }
   0xf   : > { %183 = vperm.xlu1 %314, %v161_v2   ;;  %166 = vperm.xlu0 %313, %v161_v2   ;;  %v192_v7 = vsub.s32 1, %v175_v6  ;;  %v176_v8 = vsub.s32 0, %v175_v6  ;;  %v163_v9 = vld [vmem:[%s155_s18] sm:$0x7]  ;;  %v210_v14 = vsub.s32 2, %v175_v6 }
  0x11   : > { %v193_v10 = vrot.slane %v163_v9, %v192_v7  ;;  %v177_v12 = vrot.slane %v163_v9, %v176_v8  ;;  %v211_v21 = vrot.slane %v163_v9, %v210_v14 }
  0x13   : > { %187 = vperm.xlu1 %314, %v162_v3   ;;  %171 = vperm.xlu0 %313, %v162_v3  }
  0x17   : > { %316 = vset.pattern.permute.xlu1 %v327_v4  ;;  %315 = vset.pattern.permute.xlu0 %v327_v4 }
  0x18   : > { %205 = vperm.xlu1 %316, %v162_v3   ;;  %201 = vperm.xlu0 %315, %v161_v2  }
  0x8a   : > { %v184_v11 = vpop.permute.xlu1 %183  ;;  %v167_v13 = vpop.permute.xlu0 %166 }
  0x8b   : > { %v194_v15 = vsub.f32 %v184_v11, %v193_v10  ;;  %v178_v16 = vsub.f32 %v167_v13, %v177_v12 }
  0x8d   : > { %v196_v22 = vmul.f32 %v194_v15, %v194_v15  ;;  %v180_v23 = vmul.f32 %v178_v16, %v178_v16 }
  0x8e   : > { %v188_v17 = vpop.permute.xlu1 %187  ;;  %v172_v18 = vpop.permute.xlu0 %171 }
  0x8f   : > { %v195_v19 = vsub.f32 %v188_v17, %v193_v10  ;;  %v179_v20 = vsub.f32 %v172_v18, %v177_v12  ;;  %v198_v30 = vadd.f32 %v196_v22, %v180_v23 }
  0x91   : > { %v197_v24 = vmul.f32 %v195_v19, %v195_v19  ;;  %v181_v25 = vmul.f32 %v179_v20, %v179_v20 }
  0x93   : > { %v206_v26 = vpop.permute.xlu1 %205  ;;  %v202_v27 = vpop.permute.xlu0 %201  ;;  %v199_v31 = vadd.f32 %v197_v24, %v181_v25 }
  0x94   : > { %v213_v28 = vsub.f32 %v206_v26, %v211_v21  ;;  %v212_v29 = vsub.f32 %v202_v27, %v211_v21 }
  0x96   : > { %v215_v32 = vmul.f32 %v213_v28, %v213_v28  ;;  %v214_v33 = vmul.f32 %v212_v29, %v212_v29 }
  0x98   : > { %v217_v34 = vadd.f32 %v215_v32, %v199_v31  ;;  %v216_v35 = vadd.f32 %v214_v33, %v198_v30 }
  0x9a   : > { %220 = vst.msk [vmem:[%s160_s21 + $0x8] sm:$0xff] %vm218_vm0, %v217_v34  ;;  %219 = vst.msk [vmem:[%s160_s21] sm:$0xff] %vm218_vm0, %v216_v35 }
  0x9b PF: > { %s12_s9 = sadd.s32 1, %s323_s9  }
  0x9c   : > { %p9_p4 = scmp.ge.s32.totalorder %s12_s9, 4  }
  0x9e   :  { %11 = sbr.rel (!%p9_p4) target bundleno = 1 (0x1), region = 61 }

// kernel: transition_down.3
= control target key start
LH: loop header
LB: loop body
LE: loop exit
PB: predicated region body
PF: predicated region fallthrough
CT: control target
= control target key end

     0   :  { %vm190_vm0 = vcmask 1043456   ;;  %vm141_vm1 = vcmask 64512   ;;  %s1669_s0 = inlined_call_operand.vmem [shape: bf16[256,8], index: 0, kind: input, shape index: {}]   ;;  %s1670_s1 = inlined_call_operand.vmem [shape: bf16[8,128], index: 1, kind: input, shape index: {}]   ;;  %s1671_s2 = inlined_call_operand.vmem [shape: f32[1,128], index: 2, kind: input, shape index: {}]   ;;  %s1672_s3 = inlined_call_operand.vmem [shape: f32[1,128], index: 3, kind: input, shape index: {}]   ;;  %s1673_s4 = inlined_call_operand.vmem [shape: bf16[128,128], index: 4, kind: input, shape index: {}]   ;;  %s1674_s5 = inlined_call_operand.vmem [shape: f32[1,128], index: 5, kind: input, shape index: {}]   ;;  %s1675_s6 = inlined_call_operand.vmem [shape: f32[1,128], index: 6, kind: input, shape index: {}]   ;;  %s1676_s7 = inlined_call_operand.hbm [shape: f32[32,128], index: 7, kind: output, shape index: {}]  }
   0x1   :  { %v60_v0 = vld [vmem:[%s1670_s1] sm:$0xf]  ;;  %v1287_v3 = vld [vmem:[%s1669_s0 + $0x8] sm:$0xff]   ;;  %v1288_v4 = vld [vmem:[%s1669_s0 + $0x10] sm:$0xff]  }
   0x2   :  { %v1286_v1 = vld [vmem:[%s1669_s0] sm:$0xff]   ;;  %1282 = vmatprep.subr.msk.bf16.mxu0 %vm190_vm0, %v60_v0  ;;  %v192_v2 = vsel %vm190_vm0, %v60_v0, 0  ;;  %v1289_v5 = vld [vmem:[%s1669_s0 + $0x18] sm:$0xff]   ;;  %v1291_v7 = vld [vmem:[%s1669_s0 + $0x28] sm:$0xff]  }
   0x3   :  { %1185 = vmatpush3.bf16.msra.mxu0 %v192_v2  ;;  %1186 = vmatprep.mubr.msk.bf16.mxu0 %vm141_vm1, %v1286_v1  ;;  %v1290_v6 = vld [vmem:[%s1669_s0 + $0x20] sm:$0xff]   ;;  %v1292_v8 = vld [vmem:[%s1669_s0 + $0x30] sm:$0xff]   ;;  %v1302_v9 = vld [vmem:[%s1673_s4 + $0x38] sm:$0xff]  }
   0x4   :  { %v1303_v10 = vld [vmem:[%s1673_s4 + $0x30] sm:$0xff]   ;;  %1218 = vmatprep.subr.bf16.mxu0 %v1302_v9  ;;  %1266 = vmatprep.subr.bf16.mxu1 %v1302_v9  ;;  %v1304_v11 = vld [vmem:[%s1673_s4 + $0x28] sm:$0xff]  }
   0x5   :  { %1274 = vmatpush3.bf16.msra.mxu1 %v1302_v9 }
   0x6   :  { %1187 = vmatmul.mubr.msk.bf16.vlgmr.msra.gmra.mxu0 %vm141_vm1, %v1287_v3  ;;  %1267 = vmatprep.subr.bf16.mxu1 %v1303_v10 }
   0x7   :  { %1190 = vmatprep.mubr.msk.bf16.mxu0 %vm141_vm1, %v1288_v4  ;;  %1219 = vmatpush3.bf16.msra.mxu0 %v1302_v9 }
   0x8   :  { %1220 = vmatprep.subr.bf16.mxu0 %v1303_v10 }
   0xe   :  { %1191 = vmatmul.mubr.msk.bf16.gmra.mxu0 %vm141_vm1, %v1289_v5 }
   0xf   :  { %1194 = vmatprep.mubr.msk.bf16.mxu0 %vm141_vm1, %v1290_v6 }
  0x16   :  { %1195 = vmatmul.mubr.msk.bf16.gmra.mxu0 %vm141_vm1, %v1291_v7 }
  0x17   :  { %1198 = vmatprep.mubr.msk.bf16.mxu0 %vm141_vm1, %v1292_v8 }
  0x18   :  { %12 = vsyncpa [#allocation3], 0  ;;  %1221 = vmatpush3.bf16.msra.mxu0 %v1303_v10  ;;  %1275 = vmatpush3.bf16.msra.mxu1 %v1303_v10  ;;  %v1293_v12 = vld [vmem:[%s1669_s0 + $0x38] sm:$0xff]   ;;  %v1305_v13 = vld [vmem:[%s1673_s4 + $0x20] sm:$0xff]   ;;  %vm1040_vm2 = vcmask 1041409   ;;  %vm1042_vm3 = vcmask 1042434  }
  0x19   :  { %1222 = vmatprep.subr.bf16.mxu0 %v1304_v11  ;;  %1268 = vmatprep.subr.bf16.mxu1 %v1304_v11  ;;  %v1294_v14 = vld [vmem:[%s1669_s0 + $0x40] sm:$0xff]   ;;  %v1295_v15 = vld [vmem:[%s1669_s0 + $0x48] sm:$0xff]   ;;  %v1296_v16 = vld [vmem:[%s1669_s0 + $0x50] sm:$0xff]   ;;  %vm1044_vm4 = vcmask 1043459   ;;  %vm1046_vm5 = vcmask 1044484   ;;  %vm1048_vm6 = vcmask 1045509  }
  0x1a   :  { %v1297_v17 = vld [vmem:[%s1669_s0 + $0x58] sm:$0xff]   ;;  %v1298_v18 = vld [vmem:[%s1669_s0 + $0x60] sm:$0xff]   ;;  %v1299_v19 = vld [vmem:[%s1669_s0 + $0x68] sm:$0xff]   ;;  %vm1050_vm7 = vcmask 1046534   ;;  %vm1052_vm8 = vcmask 1047559  }
  0x1b   :  { %v1300_v20 = vld [vmem:[%s1669_s0 + $0x70] sm:$0xff]   ;;  %v1301_v21 = vld [vmem:[%s1669_s0 + $0x78] sm:$0xff]   ;;  %v1308_v24 = vld [vmem:[%s1673_s4 + $0x8] sm:$0xff]  }
  0x1c   :  { %1223 = vmatpush3.bf16.msra.mxu0 %v1304_v11  ;;  %1276 = vmatpush3.bf16.msra.mxu1 %v1304_v11  ;;  %v1306_v22 = vld [vmem:[%s1673_s4 + $0x18] sm:$0xff]   ;;  %v1307_v23 = vld [vmem:[%s1673_s4 + $0x10] sm:$0xff]   ;;  %v1309_v25 = vld [vmem:[%s1673_s4] sm:$0xff]  }
  0x1d   :  { %1224 = vmatprep.subr.bf16.mxu0 %v1305_v13  ;;  %1269 = vmatprep.subr.bf16.mxu1 %v1305_v13  ;;  %v1469_v27 = vld [vmem:[%s1671_s2] ss:$0 sm:$0xff] }
  0x1e   :  { %1199 = vmatmul.mubr.msk.bf16.gmra.mxu0 %vm141_vm1, %v1293_v12  ;;  %v1476_v32 = vld [vmem:[%s1672_s3] ss:$0 sm:$0xff] }
  0x1f   :  { %1202 = vmatprep.mubr.msk.bf16.mxu0 %vm141_vm1, %v1294_v14 }
  0x20   :  { %1225 = vmatpush3.bf16.msra.mxu0 %v1305_v13  ;;  %1277 = vmatpush3.bf16.msra.mxu1 %v1305_v13 }
  0x21   :  { %1226 = vmatprep.subr.bf16.mxu0 %v1306_v22  ;;  %1270 = vmatprep.subr.bf16.mxu1 %v1306_v22 }
  0x24   :  { %1227 = vmatpush3.bf16.msra.mxu0 %v1306_v22  ;;  %1278 = vmatpush3.bf16.msra.mxu1 %v1306_v22 }
  0x25   :  { %1228 = vmatprep.subr.bf16.mxu0 %v1307_v23  ;;  %1271 = vmatprep.subr.bf16.mxu1 %v1307_v23 }
  0x26   :  { %1203 = vmatmul.mubr.msk.bf16.gmra.mxu0 %vm141_vm1, %v1295_v15 }
  0x27   :  { %1206 = vmatprep.mubr.msk.bf16.mxu0 %vm141_vm1, %v1296_v16 }
  0x28   :  { %1229 = vmatpush3.bf16.msra.mxu0 %v1307_v23  ;;  %1279 = vmatpush3.bf16.msra.mxu1 %v1307_v23 }
  0x29   :  { %1230 = vmatprep.subr.bf16.mxu0 %v1308_v24  ;;  %1272 = vmatprep.subr.bf16.mxu1 %v1308_v24 }
  0x2c   :  { %1231 = vmatpush3.bf16.msra.mxu0 %v1308_v24  ;;  %1280 = vmatpush3.bf16.msra.mxu1 %v1308_v24 }
  0x2d   :  { %1232 = vmatprep.subr.bf16.mxu0 %v1309_v25  ;;  %1273 = vmatprep.subr.bf16.mxu1 %v1309_v25 }
  0x2e   :  { %1207 = vmatmul.mubr.msk.bf16.gmra.mxu0 %vm141_vm1, %v1297_v17 }
  0x2f   :  { %1210 = vmatprep.mubr.msk.bf16.mxu0 %vm141_vm1, %v1298_v18 }
  0x30   :  { %1233 = vmatpush3.bf16.msra.mxu0 %v1309_v25  ;;  %1281 = vmatpush3.bf16.msra.mxu1 %v1309_v25 }
  0x36   :  { %1211 = vmatmul.mubr.msk.bf16.gmra.mxu0 %vm141_vm1, %v1299_v19 }
  0x37   :  { %1214 = vmatprep.mubr.msk.bf16.mxu0 %vm141_vm1, %v1300_v20 }
  0x3e   :  { %1215 = vmatmul.mubr.msk.bf16.gmra.mxu0 %vm141_vm1, %v1301_v21 }
  0xc6   :  { %v1188_v26 = vpop.f32.mrf.mxu0 }
  0xc7   :  { %v364_v30 = vmul.f32 %v1188_v26, %v1469_v27 }
  0xc8   :  { %v228_v28 = vpop.f32.mrf.mxu0 }
  0xc9   :  { %v362_v29 = vmul.f32 %v1469_v27, %v228_v28  ;;  %v403_v38 = vadd.f32 %v1476_v32, %v364_v30 }
  0xca   :  { %v1189_v31 = vpop.f32.mrf.mxu0 }
  0xcb   :  { %v365_v33 = vmul.f32 %v1189_v31, %v1469_v27  ;;  %v401_v35 = vadd.f32 %v1476_v32, %v362_v29  ;;  %v435_v46 = vmax.f32 %v403_v38, 0.0 }
  0xcc   :  { %v231_v34 = vpop.f32.mrf.mxu0 }
  0xcd   :  { %v404_v36 = vadd.f32 %v1476_v32, %v365_v33  ;;  %v363_v37 = vmul.f32 %v1469_v27, %v231_v34  ;;  %v433_v43 = vmax.f32 %v401_v35, 0.0 }
  0xce   :  { %v1192_v39 = vpop.f32.mrf.mxu0 }
  0xcf   :  { %v402_v40 = vadd.f32 %v1476_v32, %v363_v37  ;;  %v436_v41 = vmax.f32 %v404_v36, 0.0  ;;  %v368_v47 = vmul.f32 %v1192_v39, %v1469_v27 }
  0xd0   :  { %v244_v42 = vpop.f32.mrf.mxu0 }
  0xd1   :  { %v434_v44 = vmax.f32 %v402_v40, 0.0  ;;  %v366_v45 = vmul.f32 %v1469_v27, %v244_v42  ;;  %v466_v51 = vpack.c.bf16 %v436_v41, %v435_v46  ;;  %v407_v56 = vadd.f32 %v1476_v32, %v368_v47 }
  0xd2   :  { %v1193_v48 = vpop.f32.mrf.mxu0 }
  0xd3   :  { %v369_v49 = vmul.f32 %v1193_v48, %v1469_v27  ;;  %v465_v50 = vpack.c.bf16 %v434_v44, %v433_v43  ;;  %v405_v55 = vadd.f32 %v1476_v32, %v366_v45  ;;  %v439_v0 = vmax.f32 %v407_v56, 0.0 }
  0xd4   :  { %v247_v52 = vpop.f32.mrf.mxu0 }
  0xd5   :  { %v408_v53 = vadd.f32 %v1476_v32, %v369_v49  ;;  %v367_v54 = vmul.f32 %v1469_v27, %v247_v52  ;;  %1234 = vmatprep.mubr.bf16.mxu0 %v465_v50  ;;  %v437_v62 = vmax.f32 %v405_v55, 0.0 }
  0xd6   :  { %v1196_v57 = vpop.f32.mrf.mxu0  ;;  %1235 = vmatmul.mubr.bf16.vlgmr.msra.gmra.mxu0 %v466_v51 }
  0xd7   :  { %v406_v58 = vadd.f32 %v1476_v32, %v367_v54  ;;  %v440_v59 = vmax.f32 %v408_v53, 0.0  ;;  %v372_v1 = vmul.f32 %v1196_v57, %v1469_v27 }
  0xd8   :  { %v260_v60 = vpop.f32.mrf.mxu0 }
  0xd9   :  { %v370_v61 = vmul.f32 %v1469_v27, %v260_v60  ;;  %v438_v63 = vmax.f32 %v406_v58, 0.0  ;;  %v468_v6 = vpack.c.bf16 %v440_v59, %v439_v0  ;;  %v411_v10 = vadd.f32 %v1476_v32, %v372_v1 }
  0xda   :  { %v1197_v2 = vpop.f32.mrf.mxu0 }
  0xdb   :  { %v373_v3 = vmul.f32 %v1197_v2, %v1469_v27  ;;  %v467_v4 = vpack.c.bf16 %v438_v63, %v437_v62  ;;  %v409_v7 = vadd.f32 %v1476_v32, %v370_v61  ;;  %v443_v18 = vmax.f32 %v411_v10, 0.0 }
  0xdc   :  { %v263_v5 = vpop.f32.mrf.mxu0 }
  0xdd   :  { %v412_v8 = vadd.f32 %v1476_v32, %v373_v3  ;;  %v371_v9 = vmul.f32 %v1469_v27, %v263_v5  ;;  %1238 = vmatprep.mubr.bf16.mxu1 %v467_v4  ;;  %v441_v15 = vmax.f32 %v409_v7, 0.0 }
  0xde   :  { %v1200_v11 = vpop.f32.mrf.mxu0  ;;  %1239 = vmatmul.mubr.bf16.vlgmr.msra.gmra.mxu1 %v468_v6 }
  0xdf   :  { %v410_v12 = vadd.f32 %v1476_v32, %v371_v9  ;;  %v444_v13 = vmax.f32 %v412_v8, 0.0  ;;  %v376_v19 = vmul.f32 %v1200_v11, %v1469_v27 }
  0xe0   :  { %v276_v14 = vpop.f32.mrf.mxu0 }
  0xe1   :  { %v442_v16 = vmax.f32 %v410_v12, 0.0  ;;  %v374_v17 = vmul.f32 %v1469_v27, %v276_v14  ;;  %v470_v24 = vpack.c.bf16 %v444_v13, %v443_v18  ;;  %v415_v29 = vadd.f32 %v1476_v32, %v376_v19 }
  0xe2   :  { %v1201_v20 = vpop.f32.mrf.mxu0 }
  0xe3   :  { %v377_v21 = vmul.f32 %v1201_v20, %v1469_v27  ;;  %v469_v22 = vpack.c.bf16 %v442_v16, %v441_v15  ;;  %v413_v25 = vadd.f32 %v1476_v32, %v374_v17  ;;  %v447_v38 = vmax.f32 %v415_v29, 0.0 }
  0xe4   :  { %v279_v23 = vpop.f32.mrf.mxu0 }
  0xe5   :  { %v416_v26 = vadd.f32 %v1476_v32, %v377_v21  ;;  %v375_v28 = vmul.f32 %v1469_v27, %v279_v23  ;;  %1242 = vmatprep.mubr.bf16.mxu1 %v469_v22  ;;  %v445_v35 = vmax.f32 %v413_v25, 0.0 }
  0xe6   :  { %v1204_v30 = vpop.f32.mrf.mxu0  ;;  %1243 = vmatmul.mubr.bf16.gmra.mxu1 %v470_v24 }
  0xe7   :  { %v414_v31 = vadd.f32 %v1476_v32, %v375_v28  ;;  %v448_v33 = vmax.f32 %v416_v26, 0.0  ;;  %v380_v39 = vmul.f32 %v1204_v30, %v1469_v27 }
  0xe8   :  { %v292_v34 = vpop.f32.mrf.mxu0 }
  0xe9   :  { %v446_v36 = vmax.f32 %v414_v31, 0.0  ;;  %v378_v37 = vmul.f32 %v1469_v27, %v292_v34  ;;  %v472_v44 = vpack.c.bf16 %v448_v33, %v447_v38  ;;  %v419_v48 = vadd.f32 %v1476_v32, %v380_v39 }
  0xea   :  { %v1205_v40 = vpop.f32.mrf.mxu0 }
  0xeb   :  { %v381_v41 = vmul.f32 %v1205_v40, %v1469_v27  ;;  %v471_v42 = vpack.c.bf16 %v446_v36, %v445_v35  ;;  %v417_v45 = vadd.f32 %v1476_v32, %v378_v37  ;;  %v451_v56 = vmax.f32 %v419_v48, 0.0  ;;  %v1543_v48 = vld [vmem:[%s1674_s5] ss:$0 sm:$0xff]  ;;  %s1332_s5 = smov [#allocation2]  }
  0xec   :  { %v295_v43 = vpop.f32.mrf.mxu0 }
  0xed   :  { %v420_v46 = vadd.f32 %v1476_v32, %v381_v41  ;;  %v379_v47 = vmul.f32 %v1469_v27, %v295_v43  ;;  %1246 = vmatprep.mubr.bf16.mxu1 %v471_v42  ;;  %v449_v53 = vmax.f32 %v417_v45, 0.0 }
  0xee   :  { %v1208_v49 = vpop.f32.mrf.mxu0  ;;  %1247 = vmatmul.mubr.bf16.gmra.mxu1 %v472_v44 }
  0xef   :  { %v418_v50 = vadd.f32 %v1476_v32, %v379_v47  ;;  %v452_v51 = vmax.f32 %v420_v46, 0.0  ;;  %v384_v57 = vmul.f32 %v1208_v49, %v1469_v27  ;;  %v1548_v49 = vld [vmem:[%s1675_s6] ss:$0 sm:$0xff]  ;;  %s1088_s6 = sshll.u32 %s1332_s5, 4  ;;  %s1089_s6 = int_to_ptr.vmem [resolvable:$true] %s1088_s6 }
  0xf0   :  { %v308_v52 = vpop.f32.mrf.mxu0  ;;  %s1310_s30 = scalar_lea.vmem %s1089_s6, 512  ;;  %p1315_p1 = scmp.lt.s32.totalorder %s1089_s6, %s1089_s6 }
  0xf1   :  { %v450_v54 = vmax.f32 %v418_v50, 0.0  ;;  %v382_v55 = vmul.f32 %v1469_v27, %v308_v52  ;;  %v474_v62 = vpack.c.bf16 %v452_v51, %v451_v56  ;;  %v423_v2 = vadd.f32 %v1476_v32, %v384_v57  ;;  %p1311_p0 = scmp.ne.s32.totalorder %s1089_s6, %s1310_s30  ;;  %p1316_p2 = scmp.lt.s32.totalorder %s1310_s30, %s1310_s30 }
  0xf2   :  { %v1209_v58 = vpop.f32.mrf.mxu0 }
  0xf3   :  { %v385_v59 = vmul.f32 %v1209_v58, %v1469_v27  ;;  %v473_v60 = vpack.c.bf16 %v450_v54, %v449_v53  ;;  %v421_v63 = vadd.f32 %v1476_v32, %v382_v55  ;;  %v455_v10 = vmax.f32 %v423_v2, 0.0  ;;  %p1317_p3 = por %p1316_p2, %p1315_p1 }
  0xf4   :  { %v311_v61 = vpop.f32.mrf.mxu0 }
  0xf5   :  { %v424_v0 = vadd.f32 %v1476_v32, %v385_v59  ;;  %v383_v1 = vmul.f32 %v1469_v27, %v311_v61  ;;  %1250 = vmatprep.mubr.bf16.mxu1 %v473_v60  ;;  %v453_v7 = vmax.f32 %v421_v63, 0.0  ;;  %p1318_p4 = pnand %p1317_p3, %p1311_p0 }
  0xf6   :  { %v1212_v3 = vpop.f32.mrf.mxu0  ;;  %1251 = vmatmul.mubr.bf16.gmra.mxu1 %v474_v62 }
  0xf7   :  { %v422_v4 = vadd.f32 %v1476_v32, %v383_v1  ;;  %v456_v5 = vmax.f32 %v424_v0, 0.0  ;;  %v388_v11 = vmul.f32 %v1212_v3, %v1469_v27 }
  0xf8   :  { %v324_v6 = vpop.f32.mrf.mxu0 }
  0xf9   :  { %v454_v8 = vmax.f32 %v422_v4, 0.0  ;;  %v386_v9 = vmul.f32 %v1469_v27, %v324_v6  ;;  %v476_v16 = vpack.c.bf16 %v456_v5, %v455_v10  ;;  %v427_v20 = vadd.f32 %v1476_v32, %v388_v11 }
  0xfa   :  { %v1213_v12 = vpop.f32.mrf.mxu0 }
  0xfb   :  { %v389_v13 = vmul.f32 %v1213_v12, %v1469_v27  ;;  %v475_v14 = vpack.c.bf16 %v454_v8, %v453_v7  ;;  %v425_v17 = vadd.f32 %v1476_v32, %v386_v9  ;;  %v459_v29 = vmax.f32 %v427_v20, 0.0 }
  0xfc   :  { %v327_v15 = vpop.f32.mrf.mxu0 }
  0xfd   :  { %v428_v18 = vadd.f32 %v1476_v32, %v389_v13  ;;  %v387_v19 = vmul.f32 %v1469_v27, %v327_v15  ;;  %1254 = vmatprep.mubr.bf16.mxu1 %v475_v14  ;;  %v457_v25 = vmax.f32 %v425_v17, 0.0 }
  0xfe   :  { %v1216_v21 = vpop.f32.mrf.mxu0  ;;  %1255 = vmatmul.mubr.bf16.gmra.mxu1 %v476_v16 }
  0xff   :  { %v426_v22 = vadd.f32 %v1476_v32, %v387_v19  ;;  %v460_v23 = vmax.f32 %v428_v18, 0.0  ;;  %v392_v30 = vmul.f32 %v1216_v21, %v1469_v27 }
 0x100   :  { %v340_v24 = vpop.f32.mrf.mxu0 }
 0x101   :  { %v458_v26 = vmax.f32 %v426_v22, 0.0  ;;  %v390_v28 = vmul.f32 %v1469_v27, %v340_v24  ;;  %v478_v36 = vpack.c.bf16 %v460_v23, %v459_v29  ;;  %v431_v40 = vadd.f32 %v1476_v32, %v392_v30 }
 0x102   :  { %v1217_v31 = vpop.f32.mrf.mxu0 }
 0x103   :  { %v393_v33 = vmul.f32 %v1217_v31, %v1469_v27  ;;  %v477_v34 = vpack.c.bf16 %v458_v26, %v457_v25  ;;  %v429_v37 = vadd.f32 %v1476_v32, %v390_v28  ;;  %v463_v45 = vmax.f32 %v431_v40, 0.0 }
 0x104   :  { %v343_v35 = vpop.f32.mrf.mxu0 }
 0x105   :  { %v432_v38 = vadd.f32 %v1476_v32, %v393_v33  ;;  %v391_v39 = vmul.f32 %v1469_v27, %v343_v35  ;;  %1258 = vmatprep.mubr.bf16.mxu1 %v477_v34  ;;  %v461_v43 = vmax.f32 %v429_v37, 0.0 }
 0x106   :  { %1259 = vmatmul.mubr.bf16.gmra.mxu1 %v478_v36 }
 0x107   :  { %v430_v41 = vadd.f32 %v1476_v32, %v391_v39  ;;  %v464_v42 = vmax.f32 %v432_v38, 0.0 }
 0x109   :  { %v462_v44 = vmax.f32 %v430_v41, 0.0  ;;  %v480_v47 = vpack.c.bf16 %v464_v42, %v463_v45 }
 0x10b   :  { %v479_v46 = vpack.c.bf16 %v462_v44, %v461_v43 }
 0x10d   :  { %1262 = vmatprep.mubr.bf16.mxu1 %v479_v46 }
 0x10e   :  { %1263 = vmatmul.mubr.bf16.gmra.mxu1 %v480_v47 }
 0x196   :  { %v1236_v27 = vpop.f32.mrf.mxu0 }
 0x197   :  { %v715_v32 = vmul.f32 %v1236_v27, %v1543_v48 }
 0x198   :  { %v579_v50 = vpop.f32.mrf.mxu0 }
 0x199   :  { %v754_v51 = vadd.f32 %v1548_v49, %v715_v32  ;;  %v713_v52 = vmul.f32 %v1543_v48, %v579_v50 }
 0x19a   :  { %v1237_v53 = vpop.f32.mrf.mxu0 }
 0x19b   :  { %v786_v54 = vmax.f32 %v754_v51, 0.0  ;;  %v752_v55 = vadd.f32 %v1548_v49, %v713_v52  ;;  %v716_v56 = vmul.f32 %v1237_v53, %v1543_v48 }
 0x19c   :  { %v582_v57 = vpop.f32.mrf.mxu0 }
 0x19d   :  { %v828_v58 = vrot.slane %v786_v54, 4  ;;  %v784_v59 = vmax.f32 %v752_v55, 0.0  ;;  %v755_v60 = vadd.f32 %v1548_v49, %v716_v56  ;;  %v714_v61 = vmul.f32 %v1543_v48, %v582_v57 }
 0x19e   :  { %v1240_v62 = vpop.f32.mrf.mxu1 }
 0x19f   :  { %v829_v63 = vmax.f32 %v786_v54, %v828_v58  ;;  %v816_v0 = vrot.slane %v784_v59, 4  ;;  %v787_v1 = vmax.f32 %v755_v60, 0.0  ;;  %v753_v2 = vadd.f32 %v1548_v49, %v714_v61 }
 0x1a0   :  { %v719_v3 = vmul.f32 %v1240_v62, %v1543_v48  ;;  %v595_v4 = vpop.f32.mrf.mxu1 }
 0x1a1   :  { %v830_v5 = vrot.slane %v829_v63, 2  ;;  %v817_v6 = vmax.f32 %v784_v59, %v816_v0  ;;  %v834_v7 = vrot.slane %v787_v1, 4  ;;  %v785_v8 = vmax.f32 %v753_v2, 0.0 }
 0x1a2   :  { %v758_v9 = vadd.f32 %v1548_v49, %v719_v3  ;;  %v717_v10 = vmul.f32 %v1543_v48, %v595_v4  ;;  %v1241_v11 = vpop.f32.mrf.mxu1 }
 0x1a3   :  { %v831_v12 = vmax.f32 %v829_v63, %v830_v5  ;;  %v818_v13 = vrot.slane %v817_v6, 2  ;;  %v835_v14 = vmax.f32 %v787_v1, %v834_v7  ;;  %v822_v15 = vrot.slane %v785_v8, 4 }
 0x1a4   :  { %v790_v16 = vmax.f32 %v758_v9, 0.0  ;;  %v756_v17 = vadd.f32 %v1548_v49, %v717_v10  ;;  %v720_v18 = vmul.f32 %v1241_v11, %v1543_v48  ;;  %v598_v19 = vpop.f32.mrf.mxu1 }
 0x1a5   :  { %v832_v20 = vrot.slane %v831_v12, 1  ;;  %v819_v21 = vmax.f32 %v817_v6, %v818_v13  ;;  %v836_v22 = vrot.slane %v835_v14, 2  ;;  %v823_v23 = vmax.f32 %v785_v8, %v822_v15 }
 0x1a6   :  { %v852_v24 = vrot.slane %v790_v16, 4  ;;  %v788_v25 = vmax.f32 %v756_v17, 0.0  ;;  %v759_v26 = vadd.f32 %v1548_v49, %v720_v18  ;;  %v718_v28 = vmul.f32 %v1543_v48, %v598_v19  ;;  %v1244_v29 = vpop.f32.mrf.mxu1 }
 0x1a7   :  { %v820_v30 = vrot.slane %v819_v21, 1  ;;  %v837_v31 = vmax.f32 %v835_v14, %v836_v22  ;;  %v824_v33 = vrot.slane %v823_v23, 2  ;;  %v833_v39 = vmax.f32 %v831_v12, %v832_v20 }
 0x1a8   :  { %v853_v34 = vmax.f32 %v790_v16, %v852_v24  ;;  %v840_v35 = vrot.slane %v788_v25, 4  ;;  %v791_v36 = vmax.f32 %v759_v26, 0.0  ;;  %v757_v37 = vadd.f32 %v1548_v49, %v718_v28  ;;  %v611_v38 = vpop.f32.mrf.mxu1 }
 0x1a9   :  { %v825_v40 = vmax.f32 %v823_v23, %v824_v33  ;;  %v723_v41 = vmul.f32 %v1244_v29, %v1543_v48  ;;  %v821_v47 = vmax.f32 %v819_v21, %v820_v30  ;;  %v721_v50 = vmul.f32 %v1543_v48, %v611_v38 }
 0x1aa   :  { %v854_v42 = vrot.slane %v853_v34, 2  ;;  %v841_v43 = vmax.f32 %v788_v25, %v840_v35  ;;  %v858_v44 = vrot.slane %v791_v36, 4  ;;  %v789_v45 = vmax.f32 %v757_v37, 0.0  ;;  %v1245_v46 = vpop.f32.mrf.mxu1 }
 0x1ab   :  { %v826_v27 = vrot.slane %v825_v40, 1  ;;  %v762_v32 = vadd.f32 %v1548_v49, %v723_v41  ;;  %v838_v51 = vrot.slane %v837_v31, 1  ;;  %v760_v58 = vadd.f32 %v1548_v49, %v721_v50 }
 0x1ac   :  { %v842_v52 = vrot.slane %v841_v43, 2  ;;  %v859_v53 = vmax.f32 %v791_v36, %v858_v44  ;;  %v846_v54 = vrot.slane %v789_v45, 4  ;;  %v614_v55 = vpop.f32.mrf.mxu1  ;;  %v724_v59 = vmul.f32 %v1245_v46, %v1543_v48 }
 0x1ad   :  { %v827_v56 = vmax.f32 %v825_v40, %v826_v27  ;;  %v794_v57 = vmax.f32 %v762_v32, 0.0  ;;  %v855_v60 = vmax.f32 %v853_v34, %v854_v42  ;;  %v792_v3 = vmax.f32 %v760_v58, 0.0 }
 0x1ae   :  { %v843_v61 = vmax.f32 %v841_v43, %v842_v52  ;;  %v860_v62 = vrot.slane %v859_v53, 2  ;;  %v847_v63 = vmax.f32 %v789_v45, %v846_v54  ;;  %v1248_v0 = vpop.f32.mrf.mxu1  ;;  %v763_v4 = vadd.f32 %v1548_v49, %v724_v59 }
 0x1af   :  { %v1041_v1 = vsel %vm1040_vm2, %v827_v56, %v821_v47  ;;  %v876_v2 = vrot.slane %v794_v57, 4  ;;  %v839_v9 = vmax.f32 %v837_v31, %v838_v51  ;;  %v864_v12 = vrot.slane %v792_v3, 4 }
 0x1b0   :  { %v1043_v5 = vsel %vm1042_vm3, %v833_v39, %v1041_v1  ;;  %v844_v6 = vrot.slane %v843_v61, 1  ;;  %v861_v7 = vmax.f32 %v859_v53, %v860_v62  ;;  %v627_v8 = vpop.f32.mrf.mxu1  ;;  %v848_v10 = vrot.slane %v847_v63, 2 }
 0x1b1   :  { %v877_v11 = vmax.f32 %v794_v57, %v876_v2  ;;  %v795_v13 = vmax.f32 %v763_v4, 0.0  ;;  %v722_v14 = vmul.f32 %v1543_v48, %v614_v55  ;;  %v856_v16 = vrot.slane %v855_v60, 1 }
 0x1b2   :  { %v1249_v15 = vpop.f32.mrf.mxu1  ;;  %v1045_v17 = vsel %vm1044_vm4, %v839_v9, %v1043_v5  ;;  %v865_v18 = vmax.f32 %v792_v3, %v864_v12  ;;  %v727_v19 = vmul.f32 %v1248_v0, %v1543_v48  ;;  %v845_v20 = vmax.f32 %v843_v61, %v844_v6 }
 0x1b3   :  { %v862_v21 = vrot.slane %v861_v7, 1  ;;  %v882_v22 = vrot.slane %v795_v13, 4  ;;  %v761_v23 = vadd.f32 %v1548_v49, %v722_v14  ;;  %v1578_v25 = vmax.f32 %v847_v63, %v848_v10 }
 0x1b4   :  { %v630_v24 = vpop.f32.mrf.mxu1  ;;  %v878_v26 = vrot.slane %v877_v11, 2  ;;  %v866_v28 = vrot.slane %v865_v18, 2  ;;  %v766_v29 = vadd.f32 %v1548_v49, %v727_v19  ;;  %v725_v33 = vmul.f32 %v1543_v48, %v627_v8 }
 0x1b5   :  { %v883_v30 = vmax.f32 %v795_v13, %v882_v22  ;;  %v793_v31 = vmax.f32 %v761_v23, 0.0  ;;  %v728_v34 = vmul.f32 %v1249_v15, %v1543_v48  ;;  %v1585_v43 = vmax.f32 %v855_v60, %v856_v16 }
 0x1b6   :  { %v1252_v35 = vpop.f32.mrf.mxu1  ;;  %v867_v36 = vmax.f32 %v865_v18, %v866_v28  ;;  %v798_v37 = vmax.f32 %v766_v29, 0.0  ;;  %v764_v40 = vadd.f32 %v1548_v49, %v725_v33  ;;  %v1588_v44 = vsel %vm1046_vm5, %v845_v20, %v1045_v17 }
 0x1b7   :  { %v884_v38 = vrot.slane %v883_v30, 2  ;;  %v870_v39 = vrot.slane %v793_v31, 4  ;;  %v767_v41 = vadd.f32 %v1548_v49, %v728_v34  ;;  %v1590_v45 = vmax.f32 %v861_v7, %v862_v21 }
 0x1b8   :  { %v643_v42 = vpop.f32.mrf.mxu1  ;;  %v900_v46 = vrot.slane %v798_v37, 4  ;;  %v850_v47 = vrot.slane %v1578_v25, 1  ;;  %v879_v27 = vmax.f32 %v877_v11, %v878_v26  ;;  %v796_v50 = vmax.f32 %v764_v40, 0.0 }
 0x1b9   :  { %v871_v32 = vmax.f32 %v793_v31, %v870_v39  ;;  %v868_v52 = vrot.slane %v867_v36, 1  ;;  %v799_v54 = vmax.f32 %v767_v41, 0.0  ;;  %v726_v55 = vmul.f32 %v1543_v48, %v630_v24 }
 0x1ba   :  { %v1253_v51 = vpop.f32.mrf.mxu1  ;;  %v901_v53 = vmax.f32 %v798_v37, %v900_v46  ;;  %v885_v56 = vmax.f32 %v883_v30, %v884_v38  ;;  %v888_v58 = vrot.slane %v796_v50, 4  ;;  %v731_v59 = vmul.f32 %v1252_v35, %v1543_v48 }
 0x1bb   :  { %v872_v57 = vrot.slane %v871_v32, 2  ;;  %v906_v62 = vrot.slane %v799_v54, 4  ;;  %v765_v63 = vadd.f32 %v1548_v49, %v726_v55  ;;  %v729_v0 = vmul.f32 %v1543_v48, %v643_v42 }
 0x1bc   :  { %v646_v60 = vpop.f32.mrf.mxu1  ;;  %v902_v61 = vrot.slane %v901_v53, 2  ;;  %v880_v1 = vrot.slane %v879_v27, 1  ;;  %v889_v3 = vmax.f32 %v796_v50, %v888_v58  ;;  %v770_v4 = vadd.f32 %v1548_v49, %v731_v59 }
 0x1bd   :  { %v873_v2 = vmax.f32 %v871_v32, %v872_v57  ;;  %v869_v6 = vmax.f32 %v867_v36, %v868_v52  ;;  %v907_v7 = vmax.f32 %v799_v54, %v906_v62  ;;  %v797_v8 = vmax.f32 %v765_v63, 0.0 }
 0x1be   :  { %v1256_v5 = vpop.f32.mrf.mxu1  ;;  %v768_v9 = vadd.f32 %v1548_v49, %v729_v0  ;;  %v890_v11 = vrot.slane %v889_v3, 2  ;;  %v802_v12 = vmax.f32 %v770_v4, 0.0  ;;  %v732_v13 = vmul.f32 %v1253_v51, %v1543_v48 }
 0x1bf   :  { %v874_v10 = vrot.slane %v873_v2, 1  ;;  %v886_v15 = vrot.slane %v885_v56, 1  ;;  %v903_v16 = vmax.f32 %v901_v53, %v902_v61  ;;  %v894_v17 = vrot.slane %v797_v8, 4 }
 0x1c0   :  { %v659_v14 = vpop.f32.mrf.mxu1  ;;  %v800_v18 = vmax.f32 %v768_v9, 0.0  ;;  %v891_v20 = vmax.f32 %v889_v3, %v890_v11  ;;  %v924_v21 = vrot.slane %v802_v12, 4  ;;  %v771_v22 = vadd.f32 %v1548_v49, %v732_v13 }
 0x1c1   :  { %v875_v19 = vmax.f32 %v873_v2, %v874_v10  ;;  %v881_v24 = vmax.f32 %v879_v27, %v880_v1  ;;  %v908_v26 = vrot.slane %v907_v7, 2  ;;  %v895_v28 = vmax.f32 %v797_v8, %v894_v17 }
 0x1c2   :  { %v1257_v23 = vpop.f32.mrf.mxu1  ;;  %v912_v29 = vrot.slane %v800_v18, 4  ;;  %v892_v31 = vrot.slane %v891_v20, 1  ;;  %v925_v33 = vmax.f32 %v802_v12, %v924_v21  ;;  %v803_v34 = vmax.f32 %v771_v22, 0.0 }
 0x1c3   :  { %v1054_v30 = vsel %vm1040_vm2, %v875_v19, %v869_v6  ;;  %v851_v36 = vmax.f32 %v1578_v25, %v850_v47  ;;  %v896_v38 = vrot.slane %v895_v28, 2  ;;  %v887_v40 = vmax.f32 %v885_v56, %v886_v15 }
 0x1c4   :  { %v662_v35 = vpop.f32.mrf.mxu1  ;;  %v1055_v37 = vsel %vm1042_vm3, %v881_v24, %v1054_v30  ;;  %v913_v39 = vmax.f32 %v800_v18, %v912_v29  ;;  %v904_v41 = vrot.slane %v903_v16, 1  ;;  %v926_v42 = vrot.slane %v925_v33, 2 }
 0x1c5   :  { %v930_v46 = vrot.slane %v803_v34, 4  ;;  %v1604_v32 = vmax.f32 %v907_v7, %v908_v26  ;;  %v897_v50 = vmax.f32 %v895_v28, %v896_v38  ;;  %v730_v52 = vmul.f32 %v1543_v48, %v646_v60 }
 0x1c6   :  { %v1260_v27 = vpop.f32.mrf.mxu1  ;;  %v914_v51 = vrot.slane %v913_v39, 2  ;;  %v893_v53 = vmax.f32 %v891_v20, %v892_v31  ;;  %v1056_v54 = vsel %vm1044_vm4, %v887_v40, %v1055_v37  ;;  %v735_v25 = vmul.f32 %v1256_v5, %v1543_v48 }
 0x1c7   :  { %v931_v55 = vmax.f32 %v803_v34, %v930_v46  ;;  %v898_v57 = vrot.slane %v897_v50, 1  ;;  %v1609_v58 = vmax.f32 %v925_v33, %v926_v42  ;;  %v769_v56 = vadd.f32 %v1548_v49, %v730_v52 }
 0x1c8   :  { %v675_v47 = vpop.f32.mrf.mxu1  ;;  %v733_v59 = vmul.f32 %v1543_v48, %v659_v14  ;;  %v915_v61 = vmax.f32 %v913_v39, %v914_v51  ;;  %v774_v63 = vadd.f32 %v1548_v49, %v735_v25  ;;  %v736_v60 = vmul.f32 %v1257_v23, %v1543_v48 }
 0x1c9   :  { %v932_v62 = vrot.slane %v931_v55, 2  ;;  %v1049_v1 = vsel %vm1048_vm6, %v851_v36, %v1588_v44  ;;  %v1617_v2 = vmax.f32 %v903_v16, %v904_v41  ;;  %v801_v3 = vmax.f32 %v769_v56, 0.0 }
 0x1ca   :  { %v1261_v0 = vpop.f32.mrf.mxu1  ;;  %v772_v4 = vadd.f32 %v1548_v49, %v733_v59  ;;  %v910_v5 = vrot.slane %v1604_v32, 1  ;;  %v899_v6 = vmax.f32 %v897_v50, %v898_v57  ;;  %v806_v7 = vmax.f32 %v774_v63, 0.0 }
 0x1cb   :  { %v775_v8 = vadd.f32 %v1548_v49, %v736_v60  ;;  %v1057_v9 = vsel %vm1046_vm5, %v893_v53, %v1056_v54  ;;  %v928_v10 = vrot.slane %v1609_v58, 1  ;;  %v918_v11 = vrot.slane %v801_v3, 4 }
 0x1cc   :  { %v804_v12 = vmax.f32 %v772_v4, 0.0  ;;  %v916_v13 = vrot.slane %v915_v61, 1  ;;  %v933_v44 = vmax.f32 %v931_v55, %v932_v62  ;;  %v948_v14 = vrot.slane %v806_v7, 4  ;;  %v678_v16 = vpop.f32.mrf.mxu1 }
 0x1cd   :  { %v807_v15 = vmax.f32 %v775_v8, 0.0  ;;  %v919_v17 = vmax.f32 %v801_v3, %v918_v11  ;;  %v734_v19 = vmul.f32 %v1543_v48, %v662_v35  ;;  %v739_v20 = vmul.f32 %v1260_v27, %v1543_v48 }
 0x1ce   :  { %v936_v18 = vrot.slane %v804_v12, 4  ;;  %v1058_v21 = vsel %vm1048_vm6, %v899_v6, %v1057_v9  ;;  %v949_v22 = vmax.f32 %v806_v7, %v948_v14  ;;  %v737_v24 = vmul.f32 %v1543_v48, %v675_v47  ;;  %v1264_v36 = vpop.f32.mrf.mxu1 }
 0x1cf   :  { %v954_v23 = vrot.slane %v807_v15, 4  ;;  %v920_v26 = vrot.slane %v919_v17, 2  ;;  %v773_v29 = vadd.f32 %v1548_v49, %v734_v19  ;;  %v778_v30 = vadd.f32 %v1548_v49, %v739_v20 }
 0x1d0   :  { %v937_v28 = vmax.f32 %v804_v12, %v936_v18  ;;  %v950_v31 = vrot.slane %v949_v22, 2  ;;  %v776_v34 = vadd.f32 %v1548_v49, %v737_v24  ;;  %v740_v35 = vmul.f32 %v1261_v0, %v1543_v48  ;;  %v691_v57 = vpop.f32.mrf.mxu1 }
 0x1d1   :  { %v955_v33 = vmax.f32 %v807_v15, %v954_v23  ;;  %v921_v37 = vmax.f32 %v919_v17, %v920_v26  ;;  %v805_v39 = vmax.f32 %v773_v29, 0.0  ;;  %v810_v40 = vmax.f32 %v778_v30, 0.0 }
 0x1d2   :  { %v938_v38 = vrot.slane %v937_v28, 2  ;;  %v951_v41 = vmax.f32 %v949_v22, %v950_v31  ;;  %v808_v46 = vmax.f32 %v776_v34, 0.0  ;;  %v779_v27 = vadd.f32 %v1548_v49, %v740_v35 }
 0x1d3   :  { %v956_v42 = vrot.slane %v955_v33, 2  ;;  %v922_v50 = vrot.slane %v921_v37, 1  ;;  %v942_v52 = vrot.slane %v805_v39, 4  ;;  %v972_v53 = vrot.slane %v810_v40, 4 }
 0x1d4   :  { %v939_v51 = vmax.f32 %v937_v28, %v938_v38  ;;  %v917_v54 = vmax.f32 %v915_v61, %v916_v13  ;;  %v960_v25 = vrot.slane %v808_v46, 4  ;;  %v811_v47 = vmax.f32 %v779_v27, 0.0 }
 0x1d5   :  { %v957_v55 = vmax.f32 %v955_v33, %v956_v42  ;;  %v934_v56 = vrot.slane %v933_v44, 1  ;;  %v923_v59 = vmax.f32 %v921_v37, %v922_v50  ;;  %v943_v62 = vmax.f32 %v805_v39, %v942_v52 }
 0x1d6   :  { %v973_v63 = vmax.f32 %v810_v40, %v972_v53  ;;  %v929_v60 = vmax.f32 %v1609_v58, %v928_v10  ;;  %v952_v0 = vrot.slane %v951_v41, 1  ;;  %v940_v3 = vrot.slane %v939_v51, 1  ;;  %v1265_v58 = vpop.f32.mrf.mxu1 }
 0x1d7   :  { %v978_v4 = vrot.slane %v811_v47, 4  ;;  %v1051_v6 = vsel %vm1050_vm7, %v1585_v43, %v1049_v1  ;;  %v911_v7 = vmax.f32 %v1604_v32, %v910_v5  ;;  %v1061_v61 = vsel %vm1040_vm2, %v923_v59, %v917_v54 }
 0x1d8   :  { %v944_v8 = vrot.slane %v943_v62, 2  ;;  %v1059_v9 = vsel %vm1050_vm7, %v1617_v2, %v1058_v21  ;;  %v1062_v11 = vsel %vm1042_vm3, %v929_v60, %v1061_v61  ;;  %v958_v12 = vrot.slane %v957_v55, 1  ;;  %v694_v24 = vpop.f32.mrf.mxu1 }
 0x1d9   :  { %v961_v13 = vmax.f32 %v808_v46, %v960_v25  ;;  %v935_v10 = vmax.f32 %v933_v44, %v934_v56  ;;  %v974_v15 = vrot.slane %v973_v63, 2  ;;  %v738_v17 = vmul.f32 %v1543_v48, %v678_v16 }
 0x1da   :  { %v945_v14 = vmax.f32 %v943_v62, %v944_v8  ;;  %v953_v18 = vmax.f32 %v951_v41, %v952_v0  ;;  %v941_v43 = vmax.f32 %v939_v51, %v940_v3  ;;  %v979_v1 = vmax.f32 %v811_v47, %v978_v4 }
 0x1db   :  { %v743_v32 = vmul.f32 %v1264_v36, %v1543_v48  ;;  %v1063_v5 = vsel %vm1044_vm4, %v935_v10, %v1062_v11  ;;  %v777_v2 = vadd.f32 %v1548_v49, %v738_v17  ;;  %v741_v20 = vmul.f32 %v1543_v48, %v691_v57 }
 0x1dc   :  { %v946_v19 = vrot.slane %v945_v14, 1  ;;  %v959_v21 = vmax.f32 %v957_v55, %v958_v12  ;;  %v962_v22 = vrot.slane %v961_v13, 2  ;;  %v744_v23 = vmul.f32 %v1265_v58, %v1543_v48 }
 0x1dd   :  { %v782_v44 = vadd.f32 %v1548_v49, %v743_v32  ;;  %v975_v26 = vmax.f32 %v973_v63, %v974_v15  ;;  %v809_v28 = vmax.f32 %v777_v2, 0.0  ;;  %v780_v29 = vadd.f32 %v1548_v49, %v741_v20 }
 0x1de   :  { %v947_v16 = vmax.f32 %v945_v14, %v946_v19  ;;  %v1064_v30 = vsel %vm1046_vm5, %v941_v43, %v1063_v5  ;;  %v980_v31 = vrot.slane %v979_v1, 2  ;;  %v783_v34 = vadd.f32 %v1548_v49, %v744_v23 }
 0x1df   :  { %v814_v33 = vmax.f32 %v782_v44, 0.0  ;;  %v966_v36 = vrot.slane %v809_v28, 4  ;;  %v812_v37 = vmax.f32 %v780_v29, 0.0  ;;  %v742_v38 = vmul.f32 %v1543_v48, %v694_v24 }
 0x1e0   :  { %v1065_v35 = vsel %vm1048_vm6, %v947_v16, %v1064_v30  ;;  %v963_v40 = vmax.f32 %v961_v13, %v962_v22  ;;  %v815_v42 = vmax.f32 %v783_v34, 0.0  ;;  %v1053_v51 = vsel %vm1052_vm8, %v1590_v45, %v1051_v6 }
 0x1e1   :  { %v1066_v39 = vsel %vm1050_vm7, %v953_v18, %v1065_v35  ;;  %v996_v41 = vrot.slane %v814_v33, 4  ;;  %v967_v46 = vmax.f32 %v809_v28, %v966_v36  ;;  %v984_v27 = vrot.slane %v812_v37, 4  ;;  %1079 = vst [vmem:[#allocation2] sm:$0xff] %v1053_v51 }
 0x1e2   :  { %v781_v50 = vadd.f32 %v1548_v49, %v742_v38  ;;  %v1002_v53 = vrot.slane %v815_v42, 4  ;;  %v1060_v54 = vsel %vm1052_vm8, %v911_v7, %v1059_v9  ;;  %v1067_v55 = vsel %vm1052_vm8, %v959_v21, %v1066_v39 }
 0x1e3   :  { %v997_v52 = vmax.f32 %v814_v33, %v996_v41  ;;  %v981_v48 = vmax.f32 %v979_v1, %v980_v31  ;;  %v968_v25 = vrot.slane %v967_v46, 2  ;;  %v985_v47 = vmax.f32 %v812_v37, %v984_v27  ;;  %1080 = vst [vmem:[#allocation2 + $0x8] sm:$0xff] %v1060_v54  ;;  %1081 = vst [vmem:[#allocation2 + $0x10] sm:$0xff] %v1067_v55 }
 0x1e4   :  { %v813_v57 = vmax.f32 %v781_v50, 0.0  ;;  %v964_v56 = vrot.slane %v963_v40, 1  ;;  %v1003_v62 = vmax.f32 %v815_v42, %v1002_v53  ;;  %v976_v45 = vrot.slane %v975_v26, 1 }
 0x1e5   :  { %v998_v59 = vrot.slane %v997_v52, 2  ;;  %v969_v49 = vmax.f32 %v967_v46, %v968_v25  ;;  %v986_v63 = vrot.slane %v985_v47, 2  ;;  %v982_v3 = vrot.slane %v981_v48, 1 }
 0x1e6   :  { %v990_v60 = vrot.slane %v813_v57, 4  ;;  %v1004_v0 = vrot.slane %v1003_v62, 2  ;;  %v965_v61 = vmax.f32 %v963_v40, %v964_v56  ;;  %v977_v58 = vmax.f32 %v975_v26, %v976_v45 }
 0x1e7   :  { %v970_v4 = vrot.slane %v969_v49, 1  ;;  %v987_v6 = vmax.f32 %v985_v47, %v986_v63  ;;  %v999_v8 = vmax.f32 %v997_v52, %v998_v59  ;;  %v983_v10 = vmax.f32 %v981_v48, %v982_v3 }
 0x1e8   :  { %v991_v7 = vmax.f32 %v813_v57, %v990_v60  ;;  %v1005_v12 = vmax.f32 %v1003_v62, %v1004_v0 }
 0x1e9   :  { %v971_v9 = vmax.f32 %v969_v49, %v970_v4  ;;  %v988_v11 = vrot.slane %v987_v6, 1  ;;  %v1000_v18 = vrot.slane %v999_v8, 1 }
 0x1ea   :  { %v992_v13 = vrot.slane %v991_v7, 2  ;;  %v1006_v32 = vrot.slane %v1005_v12, 1 }
 0x1eb   :  { %v1068_v14 = vsel %vm1040_vm2, %v971_v9, %v965_v61  ;;  %v989_v43 = vmax.f32 %v987_v6, %v988_v11  ;;  %v1001_v2 = vmax.f32 %v999_v8, %v1000_v18 }
 0x1ec   :  { %v993_v15 = vmax.f32 %v991_v7, %v992_v13  ;;  %v1069_v17 = vsel %vm1042_vm3, %v977_v58, %v1068_v14  ;;  %v1007_v21 = vmax.f32 %v1005_v12, %v1006_v32 }
 0x1ed   :  { %v1070_v1 = vsel %vm1044_vm4, %v983_v10, %v1069_v17 }
 0x1ee   :  { %v994_v5 = vrot.slane %v993_v15, 1  ;;  %v1071_v20 = vsel %vm1046_vm5, %v989_v43, %v1070_v1 }
 0x1f0   :  { %v995_v19 = vmax.f32 %v993_v15, %v994_v5 }
 0x1f2   :  { %v1072_v22 = vsel %vm1048_vm6, %v995_v19, %v1071_v20 }
 0x1f3   :  { %v1073_v44 = vsel %vm1050_vm7, %v1001_v2, %v1072_v22 }
 0x1f4   :  { %v1074_v23 = vsel %vm1052_vm8, %v1007_v21, %v1073_v44 }
 0x1f5   :  { %1082 = vst [vmem:[#allocation2 + $0x18] sm:$0xff] %v1074_v23 }
 0x1f6   :  { %1321 = shalt.err (!%p1318_p4)
}
 0x1f7   :  { %s1333_s8 = smov 128   ;;  %s1334_s1 = smov 8  }
 0x1f8   :  { %1094 = dma.vmem_to_hbm [thread:$0]  %s1089_s6, 512, %s1676_s7, [#allocation3], %s1333_s8, %s1333_s8, %s1334_s1  }
 0x1f9   :  { %1330 = dma.done.wait [#allocation3], 512  }
 0x1fa   :  { %1331 = vsyncadd [#allocation3], 4294966784 }
 0x1fb   :  { %1098 = vsyncpa [#allocation3], 1 }

</bundles_post_ra>
